<compile_context>
chip_gen: v7x
topology: tpu7x:2x2x1
jax: 0.10.0
libtpu: 0.0.40
codegen_flags: <defaults>
</compile_context>

<pallas_src>
import functools

import jax
import jax.numpy as jnp
from jax.experimental import pallas as pl
from jax.experimental.pallas import tpu as pltpu

NODES = 10               # hidden width of the PyTorch module
LANES = 512              # last dim of the dense batch layout (multiple of 128)
DEFAULT_TILE_ROWS = 512  # 512 x 512 f32 = 1 MiB per pipelined buffer
PARAMS_LEN = 32          # 10*w1 + 10*b1 + 10*w2 + b2 + padding


def _round_up(v, m):
    return ((v + m - 1) // m) * m


def _cdiv(a, b):
    return (a + b - 1) // b


def linnet_kernel(params_ref, x_ref, o_ref):
    """One dense (TILE_ROWS, LANES) batch tile of LinNet.

    params_ref: SMEM f32[32] -- [0:10]=w1, [10:20]=b1, [20:30]=w2, [30]=b2
    x_ref:      VMEM (TILE_ROWS, LANES) f32
    o_ref:      VMEM (TILE_ROWS, LANES) f32
    """
    x = x_ref[...]
    acc = jnp.zeros_like(x)
    # Statically unrolled loop over the 10 hidden nodes: scalar splats from
    # SMEM, one tanh (EUP) + a few VPU FMAs per node, no MXU / XLU needed.
    for n in range(NODES):
        w1n = params_ref[n]
        b1n = params_ref[NODES + n]
        w2n = params_ref[2 * NODES + n]
        h = x * w1n + b1n
        s = 0.5 * jnp.tanh(0.5 * h) + 0.5      # sigmoid via a single transcendental
        acc = acc + w2n * s
    b2 = params_ref[3 * NODES]
    o_ref[...] = (acc + b2).astype(o_ref.dtype)


def pack_params(w1, b1, w2, b2):
    """Pack PyTorch-layout params into one f32[32] vector (done once at init)."""
    p = jnp.zeros((PARAMS_LEN,), jnp.float32)
    p = p.at[0:NODES].set(w1.reshape(NODES).astype(jnp.float32))
    p = p.at[NODES:2 * NODES].set(b1.reshape(NODES).astype(jnp.float32))
    p = p.at[2 * NODES:3 * NODES].set(w2.reshape(NODES).astype(jnp.float32))
    p = p.at[3 * NODES].set(b2.reshape(()).astype(jnp.float32))
    return p


@functools.partial(jax.jit, static_argnames=("tile_rows",))
def linnet_forward(x, packed_params, *, tile_rows=DEFAULT_TILE_ROWS):
    """x: (B, 1) float (PyTorch nn.Linear layout).  Returns (B, 1)."""
    B = x.shape[0]
    orig_dtype = x.dtype

    # Dense 2-D layout: pad the flat batch to (Rp, LANES) with Rp a multiple
    # of 8 sublanes (small alignment only -- NOT up to a full tile).
    rows = max(_cdiv(B, LANES), 1)
    Rp = _round_up(rows, 8)
    Bp = Rp * LANES

    # Tile rows: as large as requested, but (a) a multiple of 8, (b) capped at
    # half the rows so the grid has >= 2 steps when there is enough work
    # (feeds both TensorCores on v7x), and (c) never below 8.
    tr = _round_up(max(min(tile_rows, Rp), 1), 8)
    half = max(_round_up(_cdiv(Rp, 2), 8), 8)
    tr = min(tr, half)
    grid = _cdiv(Rp, tr)   # last block may be partial; Pallas handles it

    # in_features == 1 -> (B, 1) flattens for free; zero-pad to the aligned size.
    xf = x.astype(jnp.float32).reshape(B)
    if Bp != B:
        xf = jnp.pad(xf, (0, Bp - B))
    xt = xf.reshape(Rp, LANES)

    out = pl.pallas_call(
        linnet_kernel,
        out_shape=jax.ShapeDtypeStruct((Rp, LANES), jnp.float32),
        grid_spec=pltpu.PrefetchScalarGridSpec(
            num_scalar_prefetch=0,
            grid=(grid,),
            in_specs=[
                # Tiny packed parameter vector: lives in SMEM, read as scalars.
                pl.BlockSpec(memory_space=pltpu.MemorySpace.SMEM),
                # Dense batch tile, lane- and sublane-full.
                pl.BlockSpec((tr, LANES), lambda i: (i, 0)),
            ],
            out_specs=pl.BlockSpec((tr, LANES), lambda i: (i, 0)),
        ),
        compiler_params=pltpu.CompilerParams(
            dimension_semantics=("parallel",),   # shard batch tiles across TCs on v7x
        ),
    )(packed_params, xt)

    return out.reshape(Bp)[:B].reshape(B, 1).astype(orig_dtype)


def init_params(key):
    """Deterministic init mimicking PyTorch's default nn.Linear init (U(-1/sqrt(fan_in), +))."""
    k1, k2, k3, k4 = jax.random.split(key, 4)
    bound1 = 1.0 / jnp.sqrt(1.0)      # fan_in = 1
    bound2 = 1.0 / jnp.sqrt(NODES)    # fan_in = NODES
    w1 = jax.random.uniform(k1, (NODES, 1), jnp.float32, -bound1, bound1)
    b1 = jax.random.uniform(k2, (NODES,), jnp.float32, -bound1, bound1)
    w2 = jax.random.uniform(k3, (1, NODES), jnp.float32, -bound2, bound2)
    b2 = jax.random.uniform(k4, (1,), jnp.float32, -bound2, bound2)
    return w1, b1, w2, b2


def linnet_reference(x, w1, b1, w2, b2):
    """Pure-JAX reference with the same forward semantics as the PyTorch module."""
    h = x @ w1.T + b1
    s = 1.0 / (1.0 + jnp.exp(-h))
    return s @ w2.T + b2


if __name__ == "__main__":
    key = jax.random.PRNGKey(0)
    kx, kp = jax.random.split(key)
    w1, b1, w2, b2 = init_params(kp)
    packed = pack_params(w1, b1, w2, b2)   # one-time packing, not in the hot path

    # Small batch (original demo size): single 8x512 tile, single grid step.
    B = 8
    x = jax.random.normal(kx, (B, 1), jnp.float32)
    out = linnet_forward(x, packed)
    jax.block_until_ready(out)
    ref = linnet_reference(x, w1, b1, w2, b2)
    assert out.shape == (B, 1)
    assert jnp.allclose(out, ref, atol=1e-5, rtol=1e-5)

    # Ragged batch exercising the zero-padding path.
    B2 = 300
    x2 = jax.random.normal(jax.random.PRNGKey(1), (B2, 1), jnp.float32)
    out2 = linnet_forward(x2, packed)
    jax.block_until_ready(out2)
    ref2 = linnet_reference(x2, w1, b1, w2, b2)
    assert out2.shape == (B2, 1)
    assert jnp.allclose(out2, ref2, atol=1e-5, rtol=1e-5)

    # Larger batch exercising the multi-step (pipelined) grid with a partial
    # last block: 10000 -> 24 rows, tile = 16 rows -> grid = 2.
    B3 = 10000
    x3 = jax.random.normal(jax.random.PRNGKey(2), (B3, 1), jnp.float32)
    out3 = linnet_forward(x3, packed)
    jax.block_until_ready(out3)
    ref3 = linnet_reference(x3, w1, b1, w2, b2)
    assert out3.shape == (B3, 1)
    assert jnp.allclose(out3, ref3, atol=1e-5, rtol=1e-5)

    print("KERNEL_OK")
</pallas_src>

<mosaic_0001>
module attributes {stable_mosaic.version = 11 : i64} {
  func.func @linnet_kernel(%arg0: i32, %arg1: memref<32xf32, #tpu.memory_space<smem>>, %arg2: memref<8x512xf32, #tpu.memory_space<vmem>>, %arg3: memref<8x512xf32, #tpu.memory_space<vmem>>) attributes {dimension_semantics = [#tpu.dimension_semantics<parallel>], iteration_bounds = array<i64: 1>, scalar_prefetch = 0 : i64, scratch_operands = 0 : i64, tpu.core_type = #tpu.core_type<tc>, window_params = [{transform_indices = @transform_0, window_bounds = array<i64: 32>}, {transform_indices = @transform_1, window_bounds = array<i64: 8, 512>}, {transform_indices = @transform_2, window_bounds = array<i64: 8, 512>}]} {
    %c0 = arith.constant 0 : index
    %c0_0 = arith.constant 0 : index
    %0 = vector.load %arg2[%c0, %c0_0] : memref<8x512xf32, #tpu.memory_space<vmem>>, vector<8x512xf32>
    %cst = arith.constant 0.000000e+00 : f32
    %1 = vector.broadcast %cst : f32 to vector<8x512xf32>
    %c0_1 = arith.constant 0 : index
    %2 = memref.load %arg1[%c0_1] : memref<32xf32, #tpu.memory_space<smem>>
    %c10 = arith.constant 10 : index
    %3 = memref.load %arg1[%c10] : memref<32xf32, #tpu.memory_space<smem>>
    %c20 = arith.constant 20 : index
    %4 = memref.load %arg1[%c20] : memref<32xf32, #tpu.memory_space<smem>>
    %5 = vector.broadcast %2 : f32 to vector<8x512xf32>
    %6 = arith.mulf %0, %5 : vector<8x512xf32>
    %7 = vector.broadcast %3 : f32 to vector<8x512xf32>
    %8 = arith.addf %6, %7 : vector<8x512xf32>
    %cst_2 = arith.constant 5.000000e-01 : f32
    %9 = vector.broadcast %cst_2 : f32 to vector<8x512xf32>
    %10 = arith.mulf %9, %8 : vector<8x512xf32>
    %11 = math.tanh %10 : vector<8x512xf32>
    %cst_3 = arith.constant 5.000000e-01 : f32
    %12 = vector.broadcast %cst_3 : f32 to vector<8x512xf32>
    %13 = arith.mulf %12, %11 : vector<8x512xf32>
    %cst_4 = arith.constant 5.000000e-01 : f32
    %14 = vector.broadcast %cst_4 : f32 to vector<8x512xf32>
    %15 = arith.addf %13, %14 : vector<8x512xf32>
    %16 = vector.broadcast %4 : f32 to vector<8x512xf32>
    %17 = arith.mulf %16, %15 : vector<8x512xf32>
    %18 = arith.addf %1, %17 : vector<8x512xf32>
    %c1 = arith.constant 1 : index
    %19 = memref.load %arg1[%c1] : memref<32xf32, #tpu.memory_space<smem>>
    %c11 = arith.constant 11 : index
    %20 = memref.load %arg1[%c11] : memref<32xf32, #tpu.memory_space<smem>>
    %c21 = arith.constant 21 : index
    %21 = memref.load %arg1[%c21] : memref<32xf32, #tpu.memory_space<smem>>
    %22 = vector.broadcast %19 : f32 to vector<8x512xf32>
    %23 = arith.mulf %0, %22 : vector<8x512xf32>
    %24 = vector.broadcast %20 : f32 to vector<8x512xf32>
    %25 = arith.addf %23, %24 : vector<8x512xf32>
    %cst_5 = arith.constant 5.000000e-01 : f32
    %26 = vector.broadcast %cst_5 : f32 to vector<8x512xf32>
    %27 = arith.mulf %26, %25 : vector<8x512xf32>
    %28 = math.tanh %27 : vector<8x512xf32>
    %cst_6 = arith.constant 5.000000e-01 : f32
    %29 = vector.broadcast %cst_6 : f32 to vector<8x512xf32>
    %30 = arith.mulf %29, %28 : vector<8x512xf32>
    %cst_7 = arith.constant 5.000000e-01 : f32
    %31 = vector.broadcast %cst_7 : f32 to vector<8x512xf32>
    %32 = arith.addf %30, %31 : vector<8x512xf32>
    %33 = vector.broadcast %21 : f32 to vector<8x512xf32>
    %34 = arith.mulf %33, %32 : vector<8x512xf32>
    %35 = arith.addf %18, %34 : vector<8x512xf32>
    %c2 = arith.constant 2 : index
    %36 = memref.load %arg1[%c2] : memref<32xf32, #tpu.memory_space<smem>>
    %c12 = arith.constant 12 : index
    %37 = memref.load %arg1[%c12] : memref<32xf32, #tpu.memory_space<smem>>
    %c22 = arith.constant 22 : index
    %38 = memref.load %arg1[%c22] : memref<32xf32, #tpu.memory_space<smem>>
    %39 = vector.broadcast %36 : f32 to vector<8x512xf32>
    %40 = arith.mulf %0, %39 : vector<8x512xf32>
    %41 = vector.broadcast %37 : f32 to vector<8x512xf32>
    %42 = arith.addf %40, %41 : vector<8x512xf32>
    %cst_8 = arith.constant 5.000000e-01 : f32
    %43 = vector.broadcast %cst_8 : f32 to vector<8x512xf32>
    %44 = arith.mulf %43, %42 : vector<8x512xf32>
    %45 = math.tanh %44 : vector<8x512xf32>
    %cst_9 = arith.constant 5.000000e-01 : f32
    %46 = vector.broadcast %cst_9 : f32 to vector<8x512xf32>
    %47 = arith.mulf %46, %45 : vector<8x512xf32>
    %cst_10 = arith.constant 5.000000e-01 : f32
    %48 = vector.broadcast %cst_10 : f32 to vector<8x512xf32>
    %49 = arith.addf %47, %48 : vector<8x512xf32>
    %50 = vector.broadcast %38 : f32 to vector<8x512xf32>
    %51 = arith.mulf %50, %49 : vector<8x512xf32>
    %52 = arith.addf %35, %51 : vector<8x512xf32>
    %c3 = arith.constant 3 : index
    %53 = memref.load %arg1[%c3] : memref<32xf32, #tpu.memory_space<smem>>
    %c13 = arith.constant 13 : index
    %54 = memref.load %arg1[%c13] : memref<32xf32, #tpu.memory_space<smem>>
    %c23 = arith.constant 23 : index
    %55 = memref.load %arg1[%c23] : memref<32xf32, #tpu.memory_space<smem>>
    %56 = vector.broadcast %53 : f32 to vector<8x512xf32>
    %57 = arith.mulf %0, %56 : vector<8x512xf32>
    %58 = vector.broadcast %54 : f32 to vector<8x512xf32>
    %59 = arith.addf %57, %58 : vector<8x512xf32>
    %cst_11 = arith.constant 5.000000e-01 : f32
    %60 = vector.broadcast %cst_11 : f32 to vector<8x512xf32>
    %61 = arith.mulf %60, %59 : vector<8x512xf32>
    %62 = math.tanh %61 : vector<8x512xf32>
    %cst_12 = arith.constant 5.000000e-01 : f32
    %63 = vector.broadcast %cst_12 : f32 to vector<8x512xf32>
    %64 = arith.mulf %63, %62 : vector<8x512xf32>
    %cst_13 = arith.constant 5.000000e-01 : f32
    %65 = vector.broadcast %cst_13 : f32 to vector<8x512xf32>
    %66 = arith.addf %64, %65 : vector<8x512xf32>
    %67 = vector.broadcast %55 : f32 to vector<8x512xf32>
    %68 = arith.mulf %67, %66 : vector<8x512xf32>
    %69 = arith.addf %52, %68 : vector<8x512xf32>
    %c4 = arith.constant 4 : index
    %70 = memref.load %arg1[%c4] : memref<32xf32, #tpu.memory_space<smem>>
    %c14 = arith.constant 14 : index
    %71 = memref.load %arg1[%c14] : memref<32xf32, #tpu.memory_space<smem>>
    %c24 = arith.constant 24 : index
    %72 = memref.load %arg1[%c24] : memref<32xf32, #tpu.memory_space<smem>>
    %73 = vector.broadcast %70 : f32 to vector<8x512xf32>
    %74 = arith.mulf %0, %73 : vector<8x512xf32>
    %75 = vector.broadcast %71 : f32 to vector<8x512xf32>
    %76 = arith.addf %74, %75 : vector<8x512xf32>
    %cst_14 = arith.constant 5.000000e-01 : f32
    %77 = vector.broadcast %cst_14 : f32 to vector<8x512xf32>
    %78 = arith.mulf %77, %76 : vector<8x512xf32>
    %79 = math.tanh %78 : vector<8x512xf32>
    %cst_15 = arith.constant 5.000000e-01 : f32
    %80 = vector.broadcast %cst_15 : f32 to vector<8x512xf32>
    %81 = arith.mulf %80, %79 : vector<8x512xf32>
    %cst_16 = arith.constant 5.000000e-01 : f32
    %82 = vector.broadcast %cst_16 : f32 to vector<8x512xf32>
    %83 = arith.addf %81, %82 : vector<8x512xf32>
    %84 = vector.broadcast %72 : f32 to vector<8x512xf32>
    %85 = arith.mulf %84, %83 : vector<8x512xf32>
    %86 = arith.addf %69, %85 : vector<8x512xf32>
    %c5 = arith.constant 5 : index
    %87 = memref.load %arg1[%c5] : memref<32xf32, #tpu.memory_space<smem>>
    %c15 = arith.constant 15 : index
    %88 = memref.load %arg1[%c15] : memref<32xf32, #tpu.memory_space<smem>>
    %c25 = arith.constant 25 : index
    %89 = memref.load %arg1[%c25] : memref<32xf32, #tpu.memory_space<smem>>
    %90 = vector.broadcast %87 : f32 to vector<8x512xf32>
    %91 = arith.mulf %0, %90 : vector<8x512xf32>
    %92 = vector.broadcast %88 : f32 to vector<8x512xf32>
    %93 = arith.addf %91, %92 : vector<8x512xf32>
    %cst_17 = arith.constant 5.000000e-01 : f32
    %94 = vector.broadcast %cst_17 : f32 to vector<8x512xf32>
    %95 = arith.mulf %94, %93 : vector<8x512xf32>
    %96 = math.tanh %95 : vector<8x512xf32>
    %cst_18 = arith.constant 5.000000e-01 : f32
    %97 = vector.broadcast %cst_18 : f32 to vector<8x512xf32>
    %98 = arith.mulf %97, %96 : vector<8x512xf32>
    %cst_19 = arith.constant 5.000000e-01 : f32
    %99 = vector.broadcast %cst_19 : f32 to vector<8x512xf32>
    %100 = arith.addf %98, %99 : vector<8x512xf32>
    %101 = vector.broadcast %89 : f32 to vector<8x512xf32>
    %102 = arith.mulf %101, %100 : vector<8x512xf32>
    %103 = arith.addf %86, %102 : vector<8x512xf32>
    %c6 = arith.constant 6 : index
    %104 = memref.load %arg1[%c6] : memref<32xf32, #tpu.memory_space<smem>>
    %c16 = arith.constant 16 : index
    %105 = memref.load %arg1[%c16] : memref<32xf32, #tpu.memory_space<smem>>
    %c26 = arith.constant 26 : index
    %106 = memref.load %arg1[%c26] : memref<32xf32, #tpu.memory_space<smem>>
    %107 = vector.broadcast %104 : f32 to vector<8x512xf32>
    %108 = arith.mulf %0, %107 : vector<8x512xf32>
    %109 = vector.broadcast %105 : f32 to vector<8x512xf32>
    %110 = arith.addf %108, %109 : vector<8x512xf32>
    %cst_20 = arith.constant 5.000000e-01 : f32
    %111 = vector.broadcast %cst_20 : f32 to vector<8x512xf32>
    %112 = arith.mulf %111, %110 : vector<8x512xf32>
    %113 = math.tanh %112 : vector<8x512xf32>
    %cst_21 = arith.constant 5.000000e-01 : f32
    %114 = vector.broadcast %cst_21 : f32 to vector<8x512xf32>
    %115 = arith.mulf %114, %113 : vector<8x512xf32>
    %cst_22 = arith.constant 5.000000e-01 : f32
    %116 = vector.broadcast %cst_22 : f32 to vector<8x512xf32>
    %117 = arith.addf %115, %116 : vector<8x512xf32>
    %118 = vector.broadcast %106 : f32 to vector<8x512xf32>
    %119 = arith.mulf %118, %117 : vector<8x512xf32>
    %120 = arith.addf %103, %119 : vector<8x512xf32>
    %c7 = arith.constant 7 : index
    %121 = memref.load %arg1[%c7] : memref<32xf32, #tpu.memory_space<smem>>
    %c17 = arith.constant 17 : index
    %122 = memref.load %arg1[%c17] : memref<32xf32, #tpu.memory_space<smem>>
    %c27 = arith.constant 27 : index
    %123 = memref.load %arg1[%c27] : memref<32xf32, #tpu.memory_space<smem>>
    %124 = vector.broadcast %121 : f32 to vector<8x512xf32>
    %125 = arith.mulf %0, %124 : vector<8x512xf32>
    %126 = vector.broadcast %122 : f32 to vector<8x512xf32>
    %127 = arith.addf %125, %126 : vector<8x512xf32>
    %cst_23 = arith.constant 5.000000e-01 : f32
    %128 = vector.broadcast %cst_23 : f32 to vector<8x512xf32>
    %129 = arith.mulf %128, %127 : vector<8x512xf32>
    %130 = math.tanh %129 : vector<8x512xf32>
    %cst_24 = arith.constant 5.000000e-01 : f32
    %131 = vector.broadcast %cst_24 : f32 to vector<8x512xf32>
    %132 = arith.mulf %131, %130 : vector<8x512xf32>
    %cst_25 = arith.constant 5.000000e-01 : f32
    %133 = vector.broadcast %cst_25 : f32 to vector<8x512xf32>
    %134 = arith.addf %132, %133 : vector<8x512xf32>
    %135 = vector.broadcast %123 : f32 to vector<8x512xf32>
    %136 = arith.mulf %135, %134 : vector<8x512xf32>
    %137 = arith.addf %120, %136 : vector<8x512xf32>
    %c8 = arith.constant 8 : index
    %138 = memref.load %arg1[%c8] : memref<32xf32, #tpu.memory_space<smem>>
    %c18 = arith.constant 18 : index
    %139 = memref.load %arg1[%c18] : memref<32xf32, #tpu.memory_space<smem>>
    %c28 = arith.constant 28 : index
    %140 = memref.load %arg1[%c28] : memref<32xf32, #tpu.memory_space<smem>>
    %141 = vector.broadcast %138 : f32 to vector<8x512xf32>
    %142 = arith.mulf %0, %141 : vector<8x512xf32>
    %143 = vector.broadcast %139 : f32 to vector<8x512xf32>
    %144 = arith.addf %142, %143 : vector<8x512xf32>
    %cst_26 = arith.constant 5.000000e-01 : f32
    %145 = vector.broadcast %cst_26 : f32 to vector<8x512xf32>
    %146 = arith.mulf %145, %144 : vector<8x512xf32>
    %147 = math.tanh %146 : vector<8x512xf32>
    %cst_27 = arith.constant 5.000000e-01 : f32
    %148 = vector.broadcast %cst_27 : f32 to vector<8x512xf32>
    %149 = arith.mulf %148, %147 : vector<8x512xf32>
    %cst_28 = arith.constant 5.000000e-01 : f32
    %150 = vector.broadcast %cst_28 : f32 to vector<8x512xf32>
    %151 = arith.addf %149, %150 : vector<8x512xf32>
    %152 = vector.broadcast %140 : f32 to vector<8x512xf32>
    %153 = arith.mulf %152, %151 : vector<8x512xf32>
    %154 = arith.addf %137, %153 : vector<8x512xf32>
    %c9 = arith.constant 9 : index
    %155 = memref.load %arg1[%c9] : memref<32xf32, #tpu.memory_space<smem>>
    %c19 = arith.constant 19 : index
    %156 = memref.load %arg1[%c19] : memref<32xf32, #tpu.memory_space<smem>>
    %c29 = arith.constant 29 : index
    %157 = memref.load %arg1[%c29] : memref<32xf32, #tpu.memory_space<smem>>
    %158 = vector.broadcast %155 : f32 to vector<8x512xf32>
    %159 = arith.mulf %0, %158 : vector<8x512xf32>
    %160 = vector.broadcast %156 : f32 to vector<8x512xf32>
    %161 = arith.addf %159, %160 : vector<8x512xf32>
    %cst_29 = arith.constant 5.000000e-01 : f32
    %162 = vector.broadcast %cst_29 : f32 to vector<8x512xf32>
    %163 = arith.mulf %162, %161 : vector<8x512xf32>
    %164 = math.tanh %163 : vector<8x512xf32>
    %cst_30 = arith.constant 5.000000e-01 : f32
    %165 = vector.broadcast %cst_30 : f32 to vector<8x512xf32>
    %166 = arith.mulf %165, %164 : vector<8x512xf32>
    %cst_31 = arith.constant 5.000000e-01 : f32
    %167 = vector.broadcast %cst_31 : f32 to vector<8x512xf32>
    %168 = arith.addf %166, %167 : vector<8x512xf32>
    %169 = vector.broadcast %157 : f32 to vector<8x512xf32>
    %170 = arith.mulf %169, %168 : vector<8x512xf32>
    %171 = arith.addf %154, %170 : vector<8x512xf32>
    %c30 = arith.constant 30 : index
    %172 = memref.load %arg1[%c30] : memref<32xf32, #tpu.memory_space<smem>>
    %173 = vector.broadcast %172 : f32 to vector<8x512xf32>
    %174 = arith.addf %171, %173 : vector<8x512xf32>
    %c0_32 = arith.constant 0 : index
    %c0_33 = arith.constant 0 : index
    %175 = vector.load %arg3[%c0_32, %c0_33] : memref<8x512xf32, #tpu.memory_space<vmem>>, vector<8x512xf32>
    tpu.vector_store %arg3[%c0_32, %c0_33], %174 {strides = array<i32>} : memref<8x512xf32, #tpu.memory_space<vmem>>, vector<8x512xf32>,
    return
  }
  func.func @transform_0(%arg0: i32) -> i32 {
    %c0_i32 = arith.constant 0 : i32
    %c0_i32_0 = arith.constant 0 : i32
    return %c0_i32 : i32
  }
  func.func @transform_1(%arg0: i32) -> (i32, i32) {
    %c0_i32 = arith.constant 0 : i32
    %c0_i32_0 = arith.constant 0 : i32
    return %arg0, %c0_i32 : i32, i32
  }
  func.func @transform_2(%arg0: i32) -> (i32, i32) {
    %c0_i32 = arith.constant 0 : i32
    %c0_i32_0 = arith.constant 0 : i32
    return %arg0, %c0_i32 : i32, i32
  }
}

</mosaic_0001>

<bundles_post_ra>
// kernel: linnet_forward.1
= control target key start
LH: loop header
LB: loop body
LE: loop exit
PB: predicated region body
PF: predicated region fallthrough
CT: control target
= control target key end

     0   :  { %7 = vsyncpa [#allocation3], 0  ;;  %s720_s0 = inlined_call_operand.vmem [shape: f32[32], index: 0, kind: input, shape index: {}]   ;;  %s721_s1 = inlined_call_operand.vmem [shape: f32[8,512], index: 1, kind: input, shape index: {}]   ;;  %s722_s2 = inlined_call_operand.vmem [shape: f32[8,512], index: 2, kind: output, shape index: {}]  }
   0x1   :  { %s14_s11 = sshll.u32 %s720_s0, 4  ;;  %s15_s11 = int_to_ptr.vmem [resolvable:$true] %s14_s11 }
   0x2   :  { %s534_s12 = scalar_lea.vmem %s15_s11, 16  ;;  %p539_p1 = scmp.lt.s32.totalorder %s15_s11, %s15_s11 }
   0x3   :  { %p535_p0 = scmp.ne.s32.totalorder %s15_s11, %s534_s12  ;;  %p540_p2 = scmp.lt.s32.totalorder %s534_s12, %s534_s12 }
   0x5   :  { %p541_p3 = por %p540_p2, %p539_p1 }
   0x7   :  { %p542_p4 = pnand %p541_p3, %p535_p0 }
   0x9   :  { %545 = shalt.err (!%p542_p4)
}
   0xa   :  { %s548_s13 = smov [#allocation2]  }
   0xb   :  { %17 = dma.vmem_to_smem %s15_s11, 16, %s548_s13, [#allocation3]  }
   0xc   :  { %546 = dma.done.wait [#allocation3], 16  }
   0xd   :  { %547 = vsyncadd [#allocation3], 4294967280 }
   0xe   :  { %23 = sfence }
   0xf   :  { %s28_s14 = sld [smem:[#allocation2]]  ;;  %s423_s15 = sld [smem:[#allocation2 + $0xa]]  ;;  %v570_v0 = vld [vmem:[%s721_s1] sm:$0xff]  ;;  %v575_v1 = vld [vmem:[%s721_s1 + $0x8] sm:$0xff]  ;;  %v580_v2 = vld [vmem:[%s721_s1 + $0x10] sm:$0xff] }
  0x10   :  { %s425_s16 = sld [smem:[#allocation2 + $0x1]]  ;;  %s426_s17 = sld [smem:[#allocation2 + $0xb]]  ;;  %v585_v3 = vld [vmem:[%s721_s1 + $0x18] sm:$0xff] }
  0x11   :  { %s428_s25 = sld [smem:[#allocation2 + $0x2]]  ;;  %s429_s26 = sld [smem:[#allocation2 + $0xc]] }
  0x12   :  { %s431_s1 = sld [smem:[#allocation2 + $0x3]]  ;;  %s432_s27 = sld [smem:[#allocation2 + $0xd]] }
  0x13   :  { %s434_s28 = sld [smem:[#allocation2 + $0x4]]  ;;  %s603_s30 = sld [smem:[#allocation2 + $0xe]] }
  0x14   :  { %s424_s29 = sld [smem:[#allocation2 + $0x14]]  ;;  %s605_s3 = sld [smem:[#allocation2 + $0x15]] }
  0x15   :  { %v31_v4 = vstv %s28_s14  ;;  %v36_v9 = vstv %s423_s15  ;;  %s607_s4 = sld [smem:[#allocation2 + $0x16]]  ;;  %s611_s5 = sld [smem:[#allocation2 + $0x17]] }
  0x16   :  { %v32_v5 = vmul.f32 %v31_v4, %v570_v0  ;;  %v33_v6 = vmul.f32 %v31_v4, %v575_v1  ;;  %v34_v7 = vmul.f32 %v31_v4, %v580_v2  ;;  %v35_v8 = vmul.f32 %v31_v4, %v585_v3  ;;  %s616_s6 = sld [smem:[#allocation2 + $0x5]]  ;;  %s618_s7 = sld [smem:[#allocation2 + $0xf]] }
  0x17   :  { %v69_v10 = vstv %s425_s16  ;;  %v74_v11 = vstv %s426_s17  ;;  %v107_v28 = vstv %s428_s25  ;;  %v112_v31 = vstv %s429_s26  ;;  %s621_s8 = sld [smem:[#allocation2 + $0x6]]  ;;  %s628_s9 = sld [smem:[#allocation2 + $0x10]] }
  0x18   :  { %v37_v12 = vadd.f32 %v36_v9, %v32_v5  ;;  %v38_v13 = vadd.f32 %v36_v9, %v33_v6  ;;  %v39_v14 = vadd.f32 %v36_v9, %v34_v7  ;;  %v40_v15 = vadd.f32 %v36_v9, %v35_v8  ;;  %s634_s10 = sld [smem:[#allocation2 + $0x7]]  ;;  %s638_s11 = sld [smem:[#allocation2 + $0x11]] }
  0x19   :  { %v70_v16 = vmul.f32 %v69_v10, %v570_v0  ;;  %v71_v17 = vmul.f32 %v69_v10, %v575_v1  ;;  %v72_v18 = vmul.f32 %v69_v10, %v580_v2  ;;  %v73_v19 = vmul.f32 %v69_v10, %v585_v3  ;;  %s641_s12 = sld [smem:[#allocation2 + $0x18]]  ;;  %s651_s13 = sld [smem:[#allocation2 + $0x19]] }
  0x1a   :  { %v41_v20 = vmul.f32 0.5, %v37_v12  ;;  %v42_v21 = vmul.f32 0.5, %v38_v13  ;;  %v43_v22 = vmul.f32 0.5, %v39_v14  ;;  %v44_v27 = vmul.f32 0.5, %v40_v15  ;;  %s653_s14 = sld [smem:[#allocation2 + $0x8]]  ;;  %s662_s15 = sld [smem:[#allocation2 + $0x12]] }
  0x1b   :  { %v75_v23 = vadd.f32 %v74_v11, %v70_v16  ;;  %v76_v24 = vadd.f32 %v74_v11, %v71_v17  ;;  %v77_v25 = vadd.f32 %v74_v11, %v72_v18  ;;  %v78_v26 = vadd.f32 %v74_v11, %v73_v19  ;;  %s664_s16 = sld [smem:[#allocation2 + $0x1a]]  ;;  %s671_s17 = sld [smem:[#allocation2 + $0x1b]] }
  0x1c   :  { %454 = vtanh.f32 %v41_v20  ;;  %v108_v33 = vmul.f32 %v107_v28, %v570_v0  ;;  %v109_v34 = vmul.f32 %v107_v28, %v575_v1  ;;  %v110_v36 = vmul.f32 %v107_v28, %v580_v2  ;;  %s679_s18 = sld [smem:[#allocation2 + $0x9]]  ;;  %s682_s19 = sld [smem:[#allocation2 + $0x13]] }
  0x1d   :  { %v79_v29 = vmul.f32 0.5, %v75_v23  ;;  %v80_v30 = vmul.f32 0.5, %v76_v24  ;;  %456 = vtanh.f32 %v42_v21  ;;  %v81_v32 = vmul.f32 0.5, %v77_v25  ;;  %s697_s0 = sld [smem:[#allocation2 + $0x1c]]  ;;  %s451_s20 = sld [smem:[#allocation2 + $0x1d]] }
  0x1e   :  { %458 = vtanh.f32 %v43_v22  ;;  %v82_v35 = vmul.f32 0.5, %v78_v26  ;;  %v111_v37 = vmul.f32 %v107_v28, %v585_v3  ;;  %v113_v38 = vadd.f32 %v112_v31, %v108_v33  ;;  %s452_s21 = sld [smem:[#allocation2 + $0x1e]] }
  0x1f   :  { %460 = vtanh.f32 %v79_v29  ;;  %v114_v39 = vadd.f32 %v112_v31, %v109_v34  ;;  %v145_v40 = vstv %s431_s1  ;;  %v115_v41 = vadd.f32 %v112_v31, %v110_v36 }
  0x20   :  { %462 = vtanh.f32 %v80_v30  ;;  %v117_v42 = vmul.f32 0.5, %v113_v38  ;;  %v116_v43 = vadd.f32 %v112_v31, %v111_v37  ;;  %v146_v44 = vmul.f32 %v145_v40, %v570_v0 }
  0x21   :  { %464 = vtanh.f32 %v81_v32  ;;  %v118_v45 = vmul.f32 0.5, %v114_v39  ;;  %v147_v46 = vmul.f32 %v145_v40, %v575_v1  ;;  %v150_v47 = vstv %s432_s27 }
  0x22   :  { %466 = vtanh.f32 %v44_v27  ;;  %v119_v48 = vmul.f32 0.5, %v115_v41  ;;  %v148_v49 = vmul.f32 %v145_v40, %v580_v2  ;;  %v149_v51 = vmul.f32 %v145_v40, %v585_v3 }
  0x23   :  { %468 = vtanh.f32 %v82_v35  ;;  %v151_v52 = vadd.f32 %v150_v47, %v146_v44  ;;  %v120_v54 = vmul.f32 0.5, %v116_v43  ;;  %v152_v55 = vadd.f32 %v150_v47, %v147_v46 }
  0x24   :  { %470 = vtanh.f32 %v117_v42  ;;  %v153_v57 = vadd.f32 %v150_v47, %v148_v49  ;;  %v154_v60 = vadd.f32 %v150_v47, %v149_v51  ;;  %v183_v62 = vstv %s434_s28 }
  0x25   :  { %472 = vtanh.f32 %v118_v45  ;;  %v155_v61 = vmul.f32 0.5, %v151_v52  ;;  %v156_v6 = vmul.f32 0.5, %v152_v55  ;;  %v57_v12 = vstv %s424_s29 }
  0x26   :  { %v455_v50 = vpop.eup %454  ;;  %474 = vtanh.f32 %v119_v48  ;;  %v157_v10 = vmul.f32 0.5, %v153_v57  ;;  %v158_v15 = vmul.f32 0.5, %v154_v60  ;;  %v184_v16 = vmul.f32 %v183_v62, %v570_v0 }
  0x27   :  { %v457_v53 = vpop.eup %456  ;;  %v49_v4 = vmul.f32 0.5, %v455_v50  ;;  %476 = vtanh.f32 %v120_v54  ;;  %v188_v17 = vstv %s603_s30  ;;  %v95_v28 = vstv %s605_s3 }
  0x28   :  { %v459_v56 = vpop.eup %458  ;;  %v50_v5 = vmul.f32 0.5, %v457_v53  ;;  %478 = vtanh.f32 %v155_v61  ;;  %v185_v31 = vmul.f32 %v183_v62, %v575_v1  ;;  %v186_v32 = vmul.f32 %v183_v62, %v580_v2 }
  0x29   :  { %v461_v58 = vpop.eup %460  ;;  %v51_v8 = vmul.f32 0.5, %v459_v56  ;;  %v53_v20 = vadd.f32 0.5, %v49_v4  ;;  %480 = vtanh.f32 %v156_v6  ;;  %v189_v36 = vadd.f32 %v188_v17, %v184_v16 }
  0x2a   :  { %v463_v59 = vpop.eup %462  ;;  %v87_v9 = vmul.f32 0.5, %v461_v58  ;;  %v54_v21 = vadd.f32 0.5, %v50_v5  ;;  %482 = vtanh.f32 %v157_v10  ;;  %v187_v46 = vmul.f32 %v183_v62, %v585_v3 }
  0x2b   :  { %v465_v63 = vpop.eup %464  ;;  %v88_v13 = vmul.f32 0.5, %v463_v59  ;;  %v55_v22 = vadd.f32 0.5, %v51_v8  ;;  %v58_v34 = vmul.f32 %v57_v12, %v53_v20  ;;  %484 = vtanh.f32 %v158_v15 }
  0x2c   :  { %v467_v7 = vpop.eup %466  ;;  %v89_v14 = vmul.f32 0.5, %v465_v63  ;;  %v91_v24 = vadd.f32 0.5, %v87_v9  ;;  %v59_v35 = vmul.f32 %v57_v12, %v54_v21  ;;  %v190_v47 = vadd.f32 %v188_v17, %v185_v31 }
  0x2d   :  { %v469_v11 = vpop.eup %468  ;;  %v52_v19 = vmul.f32 0.5, %v467_v7  ;;  %v92_v26 = vadd.f32 0.5, %v88_v13  ;;  %v60_v37 = vmul.f32 %v57_v12, %v55_v22  ;;  %v133_v48 = vstv %s607_s4 }
  0x2e   :  { %v471_v18 = vpop.eup %470  ;;  %v90_v23 = vmul.f32 0.5, %v469_v11  ;;  %v93_v27 = vadd.f32 0.5, %v89_v14  ;;  %v96_v39 = vmul.f32 %v95_v28, %v91_v24  ;;  %v625_v49 = vstv %s611_s5 }
  0x2f   :  { %v473_v25 = vpop.eup %472  ;;  %v125_v30 = vmul.f32 0.5, %v471_v18  ;;  %v56_v33 = vadd.f32 0.5, %v52_v19  ;;  %v97_v41 = vmul.f32 %v95_v28, %v92_v26  ;;  %v191_v50 = vadd.f32 %v188_v17, %v186_v32 }
  0x30   :  { %v475_v29 = vpop.eup %474  ;;  %v94_v38 = vadd.f32 0.5, %v90_v23  ;;  %v98_v42 = vmul.f32 %v95_v28, %v93_v27  ;;  %v126_v43 = vmul.f32 0.5, %v473_v25  ;;  %v193_v51 = vmul.f32 0.5, %v189_v36 }
  0x31   :  { %v477_v40 = vpop.eup %476  ;;  %v127_v44 = vmul.f32 0.5, %v475_v29  ;;  %v129_v45 = vadd.f32 0.5, %v125_v30  ;;  %v61_v53 = vmul.f32 %v57_v12, %v56_v33  ;;  %v100_v55 = vadd.f32 %v96_v39, %v58_v34 }
  0x32   :  { %v479_v52 = vpop.eup %478  ;;  %v99_v54 = vmul.f32 %v95_v28, %v94_v38  ;;  %v128_v56 = vmul.f32 0.5, %v477_v40  ;;  %v101_v58 = vadd.f32 %v97_v41, %v59_v35  ;;  %v102_v59 = vadd.f32 %v98_v42, %v60_v37 }
  0x33   :  { %v481_v57 = vpop.eup %480  ;;  %v130_v60 = vadd.f32 0.5, %v126_v43  ;;  %v131_v61 = vadd.f32 0.5, %v127_v44  ;;  %v134_v63 = vmul.f32 %v133_v48, %v129_v45  ;;  %v192_v4 = vadd.f32 %v188_v17, %v187_v46 }
  0x34   :  { %v483_v62 = vpop.eup %482  ;;  %v194_v5 = vmul.f32 0.5, %v190_v47  ;;  %v221_v6 = vstv %s616_s6  ;;  %v195_v7 = vmul.f32 0.5, %v191_v50  ;;  %486 = vtanh.f32 %v193_v51 }
  0x35   :  { %v222_v8 = vmul.f32 %v221_v6, %v570_v0  ;;  %v223_v9 = vmul.f32 %v221_v6, %v575_v1  ;;  %v103_v10 = vadd.f32 %v99_v54, %v61_v53  ;;  %v132_v11 = vadd.f32 0.5, %v128_v56  ;;  %v485_v18 = vpop.eup %484 }
  0x36   :  { %v224_v12 = vmul.f32 %v221_v6, %v580_v2  ;;  %v226_v13 = vstv %s618_s7  ;;  %v163_v14 = vmul.f32 0.5, %v479_v52  ;;  %v164_v15 = vmul.f32 0.5, %v481_v57 }
  0x37   :  { %v165_v16 = vmul.f32 0.5, %v483_v62  ;;  %v227_v17 = vadd.f32 %v226_v13, %v222_v8  ;;  %v196_v19 = vmul.f32 0.5, %v192_v4  ;;  %488 = vtanh.f32 %v194_v5 }
  0x38   :  { %v225_v20 = vmul.f32 %v221_v6, %v585_v3  ;;  %v259_v21 = vstv %s621_s8  ;;  %v135_v22 = vmul.f32 %v133_v48, %v130_v60  ;;  %v136_v23 = vmul.f32 %v133_v48, %v131_v61 }
  0x39   :  { %490 = vtanh.f32 %v195_v7  ;;  %v228_v24 = vadd.f32 %v226_v13, %v223_v9  ;;  %v137_v25 = vmul.f32 %v133_v48, %v132_v11  ;;  %v138_v26 = vadd.f32 %v134_v63, %v100_v55 }
  0x3a   :  { %v229_v27 = vadd.f32 %v226_v13, %v224_v12  ;;  %v231_v28 = vmul.f32 0.5, %v227_v17  ;;  %v166_v29 = vmul.f32 0.5, %v485_v18  ;;  %v167_v30 = vadd.f32 0.5, %v163_v14 }
  0x3b   :  { %v168_v31 = vadd.f32 0.5, %v164_v15  ;;  %v260_v32 = vmul.f32 %v259_v21, %v570_v0  ;;  %v169_v33 = vadd.f32 0.5, %v165_v16  ;;  %492 = vtanh.f32 %v196_v19 }
  0x3c   :  { %v230_v34 = vadd.f32 %v226_v13, %v225_v20  ;;  %v264_v35 = vstv %s628_s9  ;;  %v139_v36 = vadd.f32 %v135_v22, %v101_v58  ;;  %v232_v37 = vmul.f32 0.5, %v228_v24 }
  0x3d   :  { %v261_v38 = vmul.f32 %v259_v21, %v575_v1  ;;  %v262_v39 = vmul.f32 %v259_v21, %v580_v2  ;;  %v140_v40 = vadd.f32 %v136_v23, %v102_v59  ;;  %v233_v41 = vmul.f32 0.5, %v229_v27 }
  0x3e   :  { %494 = vtanh.f32 %v231_v28  ;;  %v297_v42 = vstv %s634_s10  ;;  %v487_v43 = vpop.eup %486  ;;  %v141_v44 = vadd.f32 %v137_v25, %v103_v10  ;;  %v172_v45 = vmul.f32 %v625_v49, %v167_v30 }
  0x3f   :  { %v263_v46 = vmul.f32 %v259_v21, %v585_v3  ;;  %v265_v47 = vadd.f32 %v264_v35, %v260_v32  ;;  %v170_v48 = vadd.f32 0.5, %v166_v29  ;;  %v173_v50 = vmul.f32 %v625_v49, %v168_v31 }
  0x40   :  { %v174_v51 = vmul.f32 %v625_v49, %v169_v33  ;;  %v234_v52 = vmul.f32 0.5, %v230_v34  ;;  %496 = vtanh.f32 %v232_v37  ;;  %v266_v53 = vadd.f32 %v264_v35, %v261_v38 }
  0x41   :  { %v267_v54 = vadd.f32 %v264_v35, %v262_v39  ;;  %v298_v55 = vmul.f32 %v297_v42, %v570_v0  ;;  %v489_v56 = vpop.eup %488  ;;  %v201_v57 = vmul.f32 0.5, %v487_v43  ;;  %498 = vtanh.f32 %v233_v41 }
  0x42   :  { %v299_v58 = vmul.f32 %v297_v42, %v575_v1  ;;  %v302_v59 = vstv %s638_s11  ;;  %v176_v61 = vadd.f32 %v172_v45, %v138_v26  ;;  %v268_v62 = vadd.f32 %v264_v35, %v263_v46 }
  0x43   :  { %v491_v60 = vpop.eup %490  ;;  %v269_v63 = vmul.f32 0.5, %v265_v47  ;;  %v300_v4 = vmul.f32 %v297_v42, %v580_v2  ;;  %v175_v5 = vmul.f32 %v625_v49, %v170_v48  ;;  %v209_v6 = vstv %s641_s12 }
  0x44   :  { %500 = vtanh.f32 %v234_v52  ;;  %v301_v7 = vmul.f32 %v297_v42, %v585_v3  ;;  %v177_v8 = vadd.f32 %v173_v50, %v139_v36  ;;  %v202_v9 = vmul.f32 0.5, %v489_v56 }
  0x45   :  { %v270_v10 = vmul.f32 0.5, %v266_v53  ;;  %v303_v11 = vadd.f32 %v302_v59, %v298_v55  ;;  %v493_v12 = vpop.eup %492  ;;  %v203_v13 = vmul.f32 0.5, %v491_v60  ;;  %v205_v14 = vadd.f32 0.5, %v201_v57 }
  0x46   :  { %v271_v15 = vmul.f32 0.5, %v267_v54  ;;  %v304_v16 = vadd.f32 %v302_v59, %v299_v58  ;;  %v178_v49 = vadd.f32 %v174_v51, %v140_v40  ;;  %v272_v17 = vmul.f32 0.5, %v268_v62 }
  0x47   :  { %502 = vtanh.f32 %v269_v63  ;;  %v305_v18 = vadd.f32 %v302_v59, %v300_v4  ;;  %v179_v20 = vadd.f32 %v175_v5, %v141_v44  ;;  %v667_v21 = vstv %s651_s13 }
  0x48   :  { %v495_v19 = vpop.eup %494  ;;  %v306_v22 = vadd.f32 %v302_v59, %v301_v7  ;;  %v335_v23 = vstv %s653_s14  ;;  %v204_v24 = vmul.f32 0.5, %v493_v12  ;;  %v206_v25 = vadd.f32 0.5, %v202_v9 }
  0x49   :  { %504 = vtanh.f32 %v270_v10  ;;  %v307_v26 = vmul.f32 0.5, %v303_v11  ;;  %v207_v27 = vadd.f32 0.5, %v203_v13  ;;  %v210_v28 = vmul.f32 %v209_v6, %v205_v14 }
  0x4a   :  { %506 = vtanh.f32 %v271_v15  ;;  %v308_v29 = vmul.f32 0.5, %v304_v16  ;;  %v497_v30 = vpop.eup %496  ;;  %v239_v31 = vmul.f32 0.5, %v495_v19  ;;  %v309_v32 = vmul.f32 0.5, %v305_v18 }
  0x4b   :  { %508 = vtanh.f32 %v272_v17  ;;  %v336_v33 = vmul.f32 %v335_v23, %v570_v0  ;;  %v499_v34 = vpop.eup %498  ;;  %v310_v35 = vmul.f32 0.5, %v306_v22  ;;  %v337_v36 = vmul.f32 %v335_v23, %v575_v1 }
  0x4c   :  { %v338_v37 = vmul.f32 %v335_v23, %v580_v2  ;;  %v340_v38 = vstv %s662_s15  ;;  %v208_v39 = vadd.f32 0.5, %v204_v24  ;;  %v211_v40 = vmul.f32 %v209_v6, %v206_v25 }
  0x4d   :  { %v677_v41 = vstv %s664_s16  ;;  %510 = vtanh.f32 %v307_v26  ;;  %v212_v43 = vmul.f32 %v209_v6, %v207_v27  ;;  %v240_v44 = vmul.f32 0.5, %v497_v30 }
  0x4e   :  { %v501_v42 = vpop.eup %500  ;;  %512 = vtanh.f32 %v308_v29  ;;  %v339_v45 = vmul.f32 %v335_v23, %v585_v3  ;;  %v241_v46 = vmul.f32 0.5, %v499_v34  ;;  %v243_v47 = vadd.f32 0.5, %v239_v31 }
  0x4f   :  { %514 = vtanh.f32 %v309_v32  ;;  %v341_v48 = vadd.f32 %v340_v38, %v336_v33  ;;  %v214_v50 = vadd.f32 %v210_v28, %v176_v61  ;;  %v342_v51 = vadd.f32 %v340_v38, %v337_v36 }
  0x50   :  { %516 = vtanh.f32 %v310_v35  ;;  %v343_v52 = vadd.f32 %v340_v38, %v338_v37  ;;  %v213_v54 = vmul.f32 %v209_v6, %v208_v39  ;;  %v242_v55 = vmul.f32 0.5, %v501_v42 }
  0x51   :  { %v503_v53 = vpop.eup %502  ;;  %v344_v56 = vadd.f32 %v340_v38, %v339_v45  ;;  %v345_v57 = vmul.f32 0.5, %v341_v48  ;;  %v215_v58 = vadd.f32 %v211_v40, %v177_v8  ;;  %v244_v59 = vadd.f32 0.5, %v240_v44 }
  0x52   :  { %v346_v60 = vmul.f32 0.5, %v342_v51  ;;  %v347_v62 = vmul.f32 0.5, %v343_v52  ;;  %v245_v4 = vadd.f32 0.5, %v241_v46  ;;  %v248_v61 = vmul.f32 %v667_v21, %v243_v47 }
  0x53   :  { %v505_v63 = vpop.eup %504  ;;  %v348_v5 = vmul.f32 0.5, %v344_v56  ;;  %518 = vtanh.f32 %v345_v57  ;;  %v216_v9 = vadd.f32 %v212_v43, %v178_v49  ;;  %v277_v10 = vmul.f32 0.5, %v503_v53 }
  0x54   :  { %v507_v7 = vpop.eup %506  ;;  %v686_v11 = vstv %s671_s17  ;;  %520 = vtanh.f32 %v346_v60  ;;  %v217_v12 = vadd.f32 %v213_v54, %v179_v20  ;;  %v246_v13 = vadd.f32 0.5, %v242_v55 }
  0x55   :  { %v509_v6 = vpop.eup %508  ;;  %522 = vtanh.f32 %v347_v62  ;;  %v373_v8 = vstv %s679_s18  ;;  %v249_v14 = vmul.f32 %v667_v21, %v244_v59  ;;  %v278_v15 = vmul.f32 0.5, %v505_v63 }
  0x56   :  { %524 = vtanh.f32 %v348_v5  ;;  %v374_v16 = vmul.f32 %v373_v8, %v570_v0  ;;  %v250_v18 = vmul.f32 %v667_v21, %v245_v4  ;;  %v252_v49 = vadd.f32 %v248_v61, %v214_v50 }
  0x57   :  { %v511_v17 = vpop.eup %510  ;;  %v375_v19 = vmul.f32 %v373_v8, %v575_v1  ;;  %v376_v22 = vmul.f32 %v373_v8, %v580_v2  ;;  %v279_v20 = vmul.f32 0.5, %v507_v7  ;;  %v281_v24 = vadd.f32 0.5, %v277_v10 }
  0x58   :  { %v513_v23 = vpop.eup %512  ;;  %v377_v25 = vmul.f32 %v373_v8, %v585_v3  ;;  %v378_v26 = vstv %s682_s19  ;;  %v251_v28 = vmul.f32 %v667_v21, %v246_v13  ;;  %v280_v29 = vmul.f32 0.5, %v509_v6 }
  0x59   :  { %v515_v27 = vpop.eup %514  ;;  %v379_v30 = vadd.f32 %v378_v26, %v374_v16  ;;  %v380_v0 = vadd.f32 %v378_v26, %v375_v19  ;;  %v253_v32 = vadd.f32 %v249_v14, %v215_v58  ;;  %v315_v33 = vmul.f32 0.5, %v511_v17 }
  0x5a   :  { %v517_v31 = vpop.eup %516  ;;  %v381_v34 = vadd.f32 %v378_v26, %v376_v22  ;;  %v382_v35 = vadd.f32 %v378_v26, %v377_v25  ;;  %v282_v1 = vadd.f32 0.5, %v278_v15  ;;  %v316_v36 = vmul.f32 0.5, %v513_v23 }
  0x5b   :  { %v383_v2 = vmul.f32 0.5, %v379_v30  ;;  %v384_v37 = vmul.f32 0.5, %v380_v0  ;;  %v283_v38 = vadd.f32 0.5, %v279_v20  ;;  %v317_v3 = vmul.f32 0.5, %v515_v27 }
  0x5c   :  { %v385_v39 = vmul.f32 0.5, %v381_v34  ;;  %v386_v40 = vmul.f32 0.5, %v382_v35  ;;  %v254_v21 = vadd.f32 %v250_v18, %v216_v9  ;;  %v284_v43 = vadd.f32 0.5, %v280_v29 }
  0x5d   :  { %v519_v42 = vpop.eup %518  ;;  %v318_v44 = vmul.f32 0.5, %v517_v31  ;;  %526 = vtanh.f32 %v383_v2  ;;  %v286_v46 = vmul.f32 %v677_v41, %v281_v24  ;;  %v319_v47 = vadd.f32 0.5, %v315_v33 }
  0x5e   :  { %v521_v45 = vpop.eup %520  ;;  %v353_v48 = vmul.f32 0.5, %v519_v42  ;;  %528 = vtanh.f32 %v384_v37  ;;  %v287_v51 = vmul.f32 %v677_v41, %v282_v1  ;;  %v320_v52 = vadd.f32 0.5, %v316_v36 }
  0x5f   :  { %v523_v50 = vpop.eup %522  ;;  %v354_v53 = vmul.f32 0.5, %v521_v45  ;;  %530 = vtanh.f32 %v385_v39  ;;  %v288_v55 = vmul.f32 %v677_v41, %v283_v38  ;;  %v321_v56 = vadd.f32 0.5, %v317_v3 }
  0x60   :  { %v525_v54 = vpop.eup %524  ;;  %v355_v57 = vmul.f32 0.5, %v523_v50  ;;  %532 = vtanh.f32 %v386_v40  ;;  %v255_v58 = vadd.f32 %v251_v28, %v217_v12  ;;  %v289_v59 = vmul.f32 %v677_v41, %v284_v43 }
  0x61   :  { %v322_v60 = vadd.f32 0.5, %v318_v44  ;;  %v356_v62 = vmul.f32 0.5, %v525_v54  ;;  %v290_v63 = vadd.f32 %v286_v46, %v252_v49  ;;  %v324_v4 = vmul.f32 %v686_v11, %v319_v47 }
  0x62   :  { %v357_v61 = vadd.f32 0.5, %v353_v48  ;;  %v291_v5 = vadd.f32 %v287_v51, %v253_v32  ;;  %v325_v7 = vmul.f32 %v686_v11, %v320_v52  ;;  %v358_v9 = vadd.f32 0.5, %v354_v53 }
  0x63   :  { %v361_v10 = vstv %s697_s0  ;;  %v292_v6 = vadd.f32 %v288_v55, %v254_v21  ;;  %v326_v13 = vmul.f32 %v686_v11, %v321_v56  ;;  %v359_v8 = vadd.f32 0.5, %v355_v57 }
  0x64   :  { %v293_v14 = vadd.f32 %v289_v59, %v255_v58  ;;  %v327_v12 = vmul.f32 %v686_v11, %v322_v60  ;;  %v360_v41 = vadd.f32 0.5, %v356_v62  ;;  %v328_v15 = vadd.f32 %v324_v4, %v290_v63 }
  0x65   :  { %v362_v16 = vmul.f32 %v361_v10, %v357_v61  ;;  %v329_v18 = vadd.f32 %v325_v7, %v291_v5  ;;  %v363_v49 = vmul.f32 %v361_v10, %v358_v9  ;;  %v330_v22 = vadd.f32 %v326_v13, %v292_v6 }
  0x66   :  { %v364_v23 = vmul.f32 %v361_v10, %v359_v8  ;;  %v331_v25 = vadd.f32 %v327_v12, %v293_v14  ;;  %v365_v26 = vmul.f32 %v361_v10, %v360_v41  ;;  %v399_v28 = vstv %s451_s20 }
  0x67   :  { %v527_v17 = vpop.eup %526  ;;  %v366_v30 = vadd.f32 %v362_v16, %v328_v15  ;;  %v367_v31 = vadd.f32 %v363_v49, %v329_v18  ;;  %v409_v38 = vstv %s452_s21 }
  0x68   :  { %v529_v19 = vpop.eup %528  ;;  %v391_v20 = vmul.f32 0.5, %v527_v17  ;;  %v368_v34 = vadd.f32 %v364_v23, %v330_v22  ;;  %v369_v36 = vadd.f32 %v365_v26, %v331_v25 }
  0x69   :  { %v531_v24 = vpop.eup %530  ;;  %v392_v27 = vmul.f32 0.5, %v529_v19 }
  0x6a   :  { %v533_v29 = vpop.eup %532  ;;  %v393_v0 = vmul.f32 0.5, %v531_v24  ;;  %v395_v11 = vadd.f32 0.5, %v391_v20 }
  0x6b   :  { %v394_v32 = vmul.f32 0.5, %v533_v29  ;;  %v396_v33 = vadd.f32 0.5, %v392_v27 }
  0x6c   :  { %v397_v35 = vadd.f32 0.5, %v393_v0  ;;  %v400_v1 = vmul.f32 %v399_v28, %v395_v11 }
  0x6d   :  { %v398_v2 = vadd.f32 0.5, %v394_v32  ;;  %v401_v37 = vmul.f32 %v399_v28, %v396_v33 }
  0x6e   :  { %v402_v3 = vmul.f32 %v399_v28, %v397_v35  ;;  %v404_v39 = vadd.f32 %v400_v1, %v366_v30 }
  0x6f   :  { %v403_v40 = vmul.f32 %v399_v28, %v398_v2  ;;  %v405_v42 = vadd.f32 %v401_v37, %v367_v31 }
  0x70   :  { %v406_v21 = vadd.f32 %v402_v3, %v368_v34  ;;  %v410_v43 = vadd.f32 %v409_v38, %v404_v39 }
  0x71   :  { %v407_v44 = vadd.f32 %v403_v40, %v369_v36  ;;  %v411_v45 = vadd.f32 %v409_v38, %v405_v42 }
  0x72   :  { %v412_v46 = vadd.f32 %v409_v38, %v406_v21  ;;  %414 = vst [vmem:[%s722_s2] sm:$0xff] %v410_v43 }
  0x73   :  { %v413_v47 = vadd.f32 %v409_v38, %v407_v44  ;;  %415 = vst [vmem:[%s722_s2 + $0x8] sm:$0xff] %v411_v45 }
  0x74   :  { %416 = vst [vmem:[%s722_s2 + $0x10] sm:$0xff] %v412_v46 }
  0x75   :  { %417 = vst [vmem:[%s722_s2 + $0x18] sm:$0xff] %v413_v47 }
  0x76   :  { %422 = vsyncpa [#allocation3], 1 }

</bundles_post_ra>
